<compile_context>
chip_gen: v6e
topology: v6e:2x2x1
jax: 0.10.0
libtpu: 0.0.40
codegen_flags: <defaults>
</compile_context>

<pallas_src>
import functools

import jax
import jax.numpy as jnp
from jax import lax
from jax.experimental import pallas as pl
from jax.experimental.pallas import tpu as pltpu

_EPS = 1e-12  # F.normalize default eps


def _projection_head_kernel(h_ref, w1_ref, b1_ref, w2_ref, b2_ref, o_ref):
    """One row-tile of the projection head.

    h_ref : (tm, in_dim)      VMEM
    w1_ref: (in_dim, proj)    VMEM   b1_ref: (1, proj) VMEM
    w2_ref: (proj, proj)      VMEM   b2_ref: (1, proj) VMEM
    o_ref : (tm, proj)        VMEM
    """
    h = h_ref[...]

    # Linear 1 + ReLU  (MXU matmul, f32 accumulate; native-dtype operands).
    y = jnp.dot(h, w1_ref[...], preferred_element_type=jnp.float32)
    y = jnp.maximum(y + b1_ref[...].astype(jnp.float32), 0.0)

    # Linear 2 (cast hidden back to the weight dtype so bf16 weights stay on the fast MXU path).
    z = jnp.dot(y.astype(w2_ref.dtype), w2_ref[...], preferred_element_type=jnp.float32)
    z = z + b2_ref[...].astype(jnp.float32)

    # L2 normalize along the feature (lane) axis: z / max(||z||, eps) == z * rsqrt(max(||z||^2, eps^2)).
    sq = jnp.sum(z * z, axis=-1, keepdims=True)
    inv_norm = lax.rsqrt(jnp.maximum(sq, jnp.float32(_EPS * _EPS)))
    o_ref[...] = (z * inv_norm).astype(o_ref.dtype)


def projection_head_forward(h, w1, b1, w2, b2, *, block_rows: int = 256):
    """ProjectionHead forward.  h: (B, in_dim); weights stored (K, N).  Returns (B, proj)."""
    B, in_dim = h.shape
    assert w1.shape[0] == in_dim
    proj_dim = w1.shape[1]
    assert w2.shape == (proj_dim, proj_dim)
    assert b1.shape == (proj_dim,) and b2.shape == (proj_dim,)

    # Row tile: multiple of 8 sublanes; cap at block_rows and pad the batch to a whole number of tiles.
    b_rounded = ((B + 7) // 8) * 8
    tm = min(block_rows, b_rounded)
    n_tiles = pl.cdiv(b_rounded, tm)
    b_pad = n_tiles * tm
    if b_pad != B:
        h = jnp.pad(h, ((0, b_pad - B), (0, 0)))

    b1_2d = b1.reshape(1, proj_dim)
    b2_2d = b2.reshape(1, proj_dim)

    # TODO(synk): for MXU efficiency in_dim=80 could be zero-padded to 128 lanes; left as a full
    # (in_dim) block here since the K dim is tiny and the kernel stays correct for any in_dim.
    out = pl.pallas_call(
        _projection_head_kernel,
        out_shape=jax.ShapeDtypeStruct((b_pad, proj_dim), h.dtype),
        grid_spec=pltpu.PrefetchScalarGridSpec(
            num_scalar_prefetch=0,
            grid=(n_tiles,),
            in_specs=[
                pl.BlockSpec((tm, in_dim), lambda i: (i, 0)),        # h row tile
                pl.BlockSpec((in_dim, proj_dim), lambda i: (0, 0)),  # W1 (resident)
                pl.BlockSpec((1, proj_dim), lambda i: (0, 0)),       # b1
                pl.BlockSpec((proj_dim, proj_dim), lambda i: (0, 0)),# W2 (resident)
                pl.BlockSpec((1, proj_dim), lambda i: (0, 0)),       # b2
            ],
            out_specs=pl.BlockSpec((tm, proj_dim), lambda i: (i, 0)),
        ),
        compiler_params=pltpu.CompilerParams(
            dimension_semantics=("parallel",),  # row tiles are independent -> 2 TCs on v7x
        ),
    )(h, w1, b1_2d, w2, b2_2d)

    return out[:B]


def _reference_forward(h, w1, b1, w2, b2):
    """Pure-JAX reference mirroring the PyTorch forward."""
    y = jnp.maximum(h.astype(jnp.float32) @ w1.astype(jnp.float32) + b1, 0.0)
    z = y @ w2.astype(jnp.float32) + b2
    norm = jnp.sqrt(jnp.sum(z * z, axis=1, keepdims=True))
    return z / jnp.maximum(norm, _EPS)


if __name__ == "__main__":
    key = jax.random.PRNGKey(0)
    k_h, k_w1, k_b1, k_w2, k_b2 = jax.random.split(key, 5)

    B, in_dim, proj_dim = 16, 80, 128  # small shapes consistent with ProjectionHead defaults

    h = jax.random.normal(k_h, (B, in_dim), dtype=jnp.float32)
    # PyTorch-style uniform(-1/sqrt(fan_in), 1/sqrt(fan_in)) init.
    lim1 = 1.0 / (in_dim ** 0.5)
    lim2 = 1.0 / (proj_dim ** 0.5)
    w1 = jax.random.uniform(k_w1, (in_dim, proj_dim), jnp.float32, -lim1, lim1)
    b1 = jax.random.uniform(k_b1, (proj_dim,), jnp.float32, -lim1, lim1)
    w2 = jax.random.uniform(k_w2, (proj_dim, proj_dim), jnp.float32, -lim2, lim2)
    b2 = jax.random.uniform(k_b2, (proj_dim,), jnp.float32, -lim2, lim2)

    # block_rows=8 so the small test actually exercises the row-tiled grid (grid=(2,)).
    out = projection_head_forward(h, w1, b1, w2, b2, block_rows=8)
    out = jax.block_until_ready(out)

    ref = jax.block_until_ready(_reference_forward(h, w1, b1, w2, b2))
    assert out.shape == (B, proj_dim), out.shape
    assert jnp.allclose(out, ref, rtol=1e-5, atol=1e-5), float(jnp.max(jnp.abs(out - ref)))

    print("KERNEL_OK")
</pallas_src>

<mosaic_0001>
module attributes {stable_mosaic.version = 11 : i64} {
  func.func @_projection_head_kernel(%arg0: i32, %arg1: memref<8x80xf32, #tpu.memory_space<vmem>>, %arg2: memref<80x128xf32, #tpu.memory_space<vmem>>, %arg3: memref<1x128xf32, #tpu.memory_space<vmem>>, %arg4: memref<128x128xf32, #tpu.memory_space<vmem>>, %arg5: memref<1x128xf32, #tpu.memory_space<vmem>>, %arg6: memref<8x128xf32, #tpu.memory_space<vmem>>) attributes {dimension_semantics = [#tpu.dimension_semantics<parallel>], iteration_bounds = array<i64: 2>, scalar_prefetch = 0 : i64, scratch_operands = 0 : i64, tpu.core_type = #tpu.core_type<tc>, window_params = [{transform_indices = @transform_0, window_bounds = array<i64: 8, 80>}, {pipeline_mode = #tpu.pipeline_mode<synchronous>, transform_indices = @transform_1, window_bounds = array<i64: 80, 128>}, {pipeline_mode = #tpu.pipeline_mode<synchronous>, transform_indices = @transform_2, window_bounds = array<i64: 1, 128>}, {pipeline_mode = #tpu.pipeline_mode<synchronous>, transform_indices = @transform_3, window_bounds = array<i64: 128, 128>}, {pipeline_mode = #tpu.pipeline_mode<synchronous>, transform_indices = @transform_4, window_bounds = array<i64: 1, 128>}, {transform_indices = @transform_5, window_bounds = array<i64: 8, 128>}]} {
    %c0 = arith.constant 0 : index
    %c0_0 = arith.constant 0 : index
    %0 = vector.load %arg1[%c0, %c0_0] : memref<8x80xf32, #tpu.memory_space<vmem>>, vector<8x80xf32>
    %c0_1 = arith.constant 0 : index
    %c0_2 = arith.constant 0 : index
    %1 = vector.load %arg2[%c0_1, %c0_2] : memref<80x128xf32, #tpu.memory_space<vmem>>, vector<80x128xf32>
    %cst = arith.constant dense<0.000000e+00> : vector<8x128xf32>
    %2 = tpu.matmul %0, %1, %cst {dimension_numbers = #tpu.dot_dimension_numbers<[1], [0], [0], [1], [0, 0, 1, 1], [], []>} : vector<8x80xf32>, vector<80x128xf32>, vector<8x128xf32> -> vector<8x128xf32>
    %c0_3 = arith.constant 0 : index
    %c0_4 = arith.constant 0 : index
    %3 = vector.load %arg3[%c0_3, %c0_4] : memref<1x128xf32, #tpu.memory_space<vmem>>, vector<1x128xf32>
    %4 = vector.broadcast %3 : vector<1x128xf32> to vector<8x128xf32>
    %5 = arith.addf %2, %4 : vector<8x128xf32>
    %cst_5 = arith.constant 0.000000e+00 : f32
    %6 = vector.broadcast %cst_5 : f32 to vector<8x128xf32>
    %7 = arith.maximumf %5, %6 : vector<8x128xf32>
    %c0_6 = arith.constant 0 : index
    %c0_7 = arith.constant 0 : index
    %8 = vector.load %arg4[%c0_6, %c0_7] : memref<128x128xf32, #tpu.memory_space<vmem>>, vector<128x128xf32>
    %cst_8 = arith.constant dense<0.000000e+00> : vector<8x128xf32>
    %9 = tpu.matmul %7, %8, %cst_8 {dimension_numbers = #tpu.dot_dimension_numbers<[1], [0], [0], [1], [0, 0, 1, 1], [], []>} : vector<8x128xf32>, vector<128x128xf32>, vector<8x128xf32> -> vector<8x128xf32>
    %c0_9 = arith.constant 0 : index
    %c0_10 = arith.constant 0 : index
    %10 = vector.load %arg5[%c0_9, %c0_10] : memref<1x128xf32, #tpu.memory_space<vmem>>, vector<1x128xf32>
    %11 = vector.broadcast %10 : vector<1x128xf32> to vector<8x128xf32>
    %12 = arith.addf %9, %11 : vector<8x128xf32>
    %13 = arith.mulf %12, %12 : vector<8x128xf32>
    %cst_11 = arith.constant dense<0.000000e+00> : vector<8xf32>
    %14 = vector.multi_reduction <add>, %13, %cst_11 [1] : vector<8x128xf32> to vector<8xf32>
    %15 = vector.shape_cast %14 : vector<8xf32> to vector<8x1xf32>
    %cst_12 = arith.constant 1.000000e-24 : f32
    %16 = vector.broadcast %cst_12 : f32 to vector<8x1xf32>
    %17 = arith.maximumf %15, %16 : vector<8x1xf32>
    %18 = math.rsqrt %17 : vector<8x1xf32>
    %19 = vector.broadcast %18 : vector<8x1xf32> to vector<8x128xf32>
    %20 = arith.mulf %12, %19 : vector<8x128xf32>
    %c0_13 = arith.constant 0 : index
    %c0_14 = arith.constant 0 : index
    %21 = vector.load %arg6[%c0_13, %c0_14] : memref<8x128xf32, #tpu.memory_space<vmem>>, vector<8x128xf32>
    tpu.vector_store %arg6[%c0_13, %c0_14], %20 {strides = array<i32>} : memref<8x128xf32, #tpu.memory_space<vmem>>, vector<8x128xf32>,
    return
  }
  func.func @transform_0(%arg0: i32) -> (i32, i32) {
    %c0_i32 = arith.constant 0 : i32
    %c0_i32_0 = arith.constant 0 : i32
    return %arg0, %c0_i32 : i32, i32
  }
  func.func @transform_1(%arg0: i32) -> (i32, i32) {
    %c0_i32 = arith.constant 0 : i32
    %c0_i32_0 = arith.constant 0 : i32
    %c0_i32_1 = arith.constant 0 : i32
    return %c0_i32, %c0_i32_0 : i32, i32
  }
  func.func @transform_2(%arg0: i32) -> (i32, i32) {
    %c0_i32 = arith.constant 0 : i32
    %c0_i32_0 = arith.constant 0 : i32
    %c0_i32_1 = arith.constant 0 : i32
    return %c0_i32, %c0_i32_0 : i32, i32
  }
  func.func @transform_3(%arg0: i32) -> (i32, i32) {
    %c0_i32 = arith.constant 0 : i32
    %c0_i32_0 = arith.constant 0 : i32
    %c0_i32_1 = arith.constant 0 : i32
    return %c0_i32, %c0_i32_0 : i32, i32
  }
  func.func @transform_4(%arg0: i32) -> (i32, i32) {
    %c0_i32 = arith.constant 0 : i32
    %c0_i32_0 = arith.constant 0 : i32
    %c0_i32_1 = arith.constant 0 : i32
    return %c0_i32, %c0_i32_0 : i32, i32
  }
  func.func @transform_5(%arg0: i32) -> (i32, i32) {
    %c0_i32 = arith.constant 0 : i32
    %c0_i32_0 = arith.constant 0 : i32
    return %arg0, %c0_i32 : i32, i32
  }
}

</mosaic_0001>

<bundles_post_ra>
// kernel: tpu_custom_call.1
= control target key start
LH: loop header
LB: loop body
LE: loop exit
PB: predicated region body
PF: predicated region fallthrough
CT: control target
= control target key end

     0   :  { %10 = vsyncpa [#allocation3], 0  ;;  %s1137_s0 = inlined_call_operand.hbm [shape: f32[16,80], index: 0, kind: input, shape index: {}]   ;;  %s1138_s1 = inlined_call_operand.hbm [shape: f32[80,128], index: 1, kind: input, shape index: {}]   ;;  %s1139_s2 = inlined_call_operand.vmem [shape: f32[1,128], index: 2, kind: input, shape index: {}]   ;;  %s1140_s3 = inlined_call_operand.hbm [shape: f32[128,128], index: 3, kind: input, shape index: {}]   ;;  %s1141_s4 = inlined_call_operand.vmem [shape: f32[1,128], index: 4, kind: input, shape index: {}]   ;;  %s1142_s5 = inlined_call_operand.hbm [shape: f32[16,128], index: 5, kind: output, shape index: {}]  }
   0x1   :  { %12 = vsyncpa [#allocation3 + $0x1], 0 }
   0x2   :  { %13 = vsyncpa [#allocation6], 0 }
   0x3   :  { %14 = vsyncpa [#allocation4], 0 }
   0x4   :  { %16 = vsyncpa [#allocation4 + $0x1], 0  ;;  %s931_s18 = smov 0   ;;  %s933_s19 = smov 0  }
   0x5   :  { %s935_s20 = smov 0   ;;  %s937_s21 = smov 0  }
   0x6 LB: > { %s952_s22 = sadd.s32 4294967295, %s891_s21   ;;  %s565_s23 = sadd.s32 4294967294, %s891_s21   ;;  %s891_s21 = sphi %s937_s21, %s1164_s21   ;;  %s887_s20 = sphi %s935_s20, %s1163_s20   ;;  %s883_s19 = sphi %s933_s19, %s1162_s19   ;;  %s879_s18 = sphi %s931_s18, %s1161_s18  }
   0x7   : > { %p42_p0 = scmp.ne.s32.totalorder %s883_s19, %s879_s18  ;;  %p1143_p1 = scmp.eq.s32.totalorder %s952_s22, 0 }
   0x8   : > { %p156_p3 = scmp.eq.s32.totalorder %s565_s23, 1  ;;  %p566_p5 = scmp.ge.s32.totalorder %s891_s21, 1 }
   0x9   : > { %p961_p4 = por %p1143_p1, %p42_p0  ;;  %p163_p7 = scmp.lt.s32.totalorder %s891_s21, 3 }
   0xa   : > { %p966_p6 = por %p156_p3, %p42_p0  ;;  %s893_s27 = smov [#allocation5]  }
   0xb   : > { %s1147_s24 = scalar_select %p961_p4, 1, 0 }
   0xc   : > { %s1148_s25 = scalar_select %p966_p6, 1, 0 }
   0xd   : > { %p971_p8 = pnand %p566_p5, %p163_p7  ;;  %s175_s28 = sshll.u32 %s893_s27, 4  ;;  %s176_s28 = int_to_ptr.vmem [resolvable:$true] %s175_s28 }
   0xe   : > { %s894_s30 = smov [#allocation7]   ;;  %s754_s7 = scalar_lea.vmem %s176_s28, 1280 }
   0xf   : > { %s1149_s26 = scalar_select %p971_p8, 1, 0 }
  0x10   : > { %p682_p9 = pneg %p971_p8  ;;  %s191_s6 = sshll.u32 %s894_s30, 4  ;;  %s192_s6 = int_to_ptr.vmem [resolvable:$true] %s191_s6 }
  0x11   : > { %p755_p13 = scmp.ne.s32.totalorder %s176_s28, %s754_s7  ;;  %p762_p5 = scmp.lt.s32.totalorder %s176_s28, %s176_s28 }
  0x12   : > { %p980_p11 = pnand %p682_p9, %p1143_p1  ;;  %p763_p7 = scmp.lt.s32.totalorder %s754_s7, %s754_s7 }
  0x14   : > { %p745_p12 = pneg %p980_p11  ;;  %p764_p10 = por %p763_p7, %p762_p5 }
  0x16   : > { %p757_p0 = pnand %p755_p13, %p745_p12 }
  0x18   : > { %p758_p3 = pneg %p757_p0 }
  0x1a   : > { %p765_p9 = pnand %p764_p10, %p758_p3 }
  0x1c   : > { %768 = shalt.err (!%p765_p9)
}
  0x1d   : > { %s895_s8 = smov 128   ;;  %s896_s9 = smov 8  }
  0x1e   : > { %685 = dma.hbm_to_vmem [thread:$0]  (!%p980_p11), %s1138_s1, 1280, %s176_s28, [#allocation6], %s895_s8, %s895_s8, %s896_s9  }
  0x1f   : > { %s780_s12 = scalar_lea.vmem %s192_s6, 2048  ;;  %p788_p2 = scmp.lt.s32.totalorder %s192_s6, %s192_s6 }
  0x20   : > { %p781_p1 = scmp.ne.s32.totalorder %s192_s6, %s780_s12  ;;  %p789_p6 = scmp.lt.s32.totalorder %s780_s12, %s780_s12 }
  0x22   : > { %p783_p13 = pnand %p781_p1, %p745_p12  ;;  %p790_p5 = por %p789_p6, %p788_p2 }
  0x24   : > { %p784_p0 = pneg %p783_p13 }
  0x26   : > { %p791_p10 = pnand %p790_p5, %p784_p0 }
  0x28   : > { %794 = shalt.err (!%p791_p10)
}
  0x29   : > { %688 = dma.hbm_to_vmem [thread:$0]  (!%p980_p11), %s1140_s3, 2048, %s192_s6, [#allocation6], %s895_s8, %s895_s8, %s896_s9  }
  0x2a   : > { %s1003_s15 = sadd.s32 1, %s891_s21   ;;  %s29_s16 = sadd.s32 1, %s887_s20 }
  0x2b   : > { %s26_s17 = ssub.s32 %s891_s21, %s1003_s15  ;;  %p36_p1 = scmp.ne.s32.totalorder %s887_s20, %s883_s19 }
  0x2c   : > { %p27_p2 = scmp.eq.s32.totalorder %s26_s17, 0  ;;  %p37_p6 = scmp.eq.s32.totalorder %s891_s21, 0 }
  0x2d   : > { %p1151_p12 = scmp.eq.s32.totalorder %s952_s22, 1  ;;  %p699_p7 = scmp.lt.s32.totalorder %s891_s21, 2 }
  0x2e   : > { %s1019_s27 = scalar_select %p27_p2, %s887_s20, %s29_s16  }
  0x2f   : > { %p1013_p3 = por %p1151_p12, %p36_p1  ;;  %p38_p9 = por %p37_p6, %p36_p1 }
  0x30   : > { %s208_s28 = sand.u32 1, %s887_s20   ;;  %s571_s30 = sshll.u32 %s891_s21, 7 }
  0x31   : > { %s1152_s23 = scalar_select %p1013_p3, 1, 0 }
  0x32   : > { %s570_s29 = sshll.u32 %s208_s28, 3  ;;  %s1026_s8 = scalar_lea.hbm %s1137_s0, %s571_s30 }
  0x33   : > { %s212_s9 = scalar_lea.vmem [#allocation2], %s570_s29  ;;  %p1028_p11 = pnand %p699_p7, %p38_p9 }
  0x34   : > { %s219_s10 = sshll.u32 %s212_s9, 4  ;;  %s209_s12 = scalar_lea.sflag [#allocation3], %s208_s28  ;;  %s220_s10 = int_to_ptr.vmem [resolvable:$true] %s219_s10 }
  0x35   : > { %s795_s13 = scalar_lea.hbm %s1026_s8, 128  ;;  %p797_p0 = pneg %p1028_p11 }
  0x36   : > { %p796_p13 = scmp.ne.s32.totalorder %s1026_s8, %s795_s13  ;;  %s800_s17 = scalar_lea.hbm %s1137_s0, 256 }
  0x37   : > { %p801_p1 = scmp.lt.s32.totalorder %s1026_s8, %s1137_s0  ;;  %p802_p2 = scmp.lt.s32.totalorder %s800_s17, %s795_s13 }
  0x38   : > { %p798_p5 = pnand %p797_p0, %p796_p13 }
  0x39   : > { %p803_p6 = por %p802_p2, %p801_p1 }
  0x3a   : > { %p799_p10 = pneg %p798_p5 }
  0x3c   : > { %p804_p12 = pnand %p803_p6, %p799_p10 }
  0x3e   : > { %807 = shalt.err (!%p804_p12)
}
  0x3f   : > { %s808_s6 = scalar_lea.vmem %s220_s10, 128  ;;  %s897_s28 = smov [#allocation2]  }
  0x40   : > { %p809_p7 = scmp.ne.s32.totalorder %s220_s10, %s808_s6  ;;  %s813_s7 = sshll.u32 %s897_s28, 4  ;;  %s814_s7 = int_to_ptr.vmem [resolvable:$false] %s813_s7 }
  0x41   : > { %s815_s9 = scalar_lea.vmem %s814_s7, 256  ;;  %p816_p13 = scmp.lt.s32.totalorder %s220_s10, %s814_s7 }
  0x42   : > { %p811_p9 = pnand %p809_p7, %p797_p0  ;;  %p817_p5 = scmp.lt.s32.totalorder %s815_s9, %s808_s6 }
  0x44   : > { %p812_p3 = pneg %p811_p9  ;;  %p818_p4 = por %p817_p5, %p816_p13 }
  0x46   : > { %p819_p8 = pnand %p818_p4, %p812_p3 }
  0x48   : > { %822 = shalt.err (!%p819_p8)
}
  0x49   : > { %692 = dma.hbm_to_vmem [thread:$0]  (!%p1028_p11), %s1026_s8, 128, %s220_s10, %s209_s12  }
  0x4a   : > { %p1154_p10 = scmp.ne.s32.totalorder %s1149_s26, 0 }
  0x4b   : > { %s1049_s13 = sand.u32 (!%p1154_p10), 1, %s883_s19   ;;  %p1155_p4 = scmp.ne.s32.totalorder (!%p1154_p10), %s1147_s24, 0 }
  0x4c   : > { %228 = sbr.rel (%p1154_p10) target bundleno = 670 (0x29e), region = 40  ;;  %s573_s14 = sshll.u32 (!%p1154_p10), %s1049_s13, 3 }
  0x4d   : > { %s231_s16 = scalar_lea.sflag (!%p1154_p10), [#allocation3], %s1049_s13  ;;  %s1055_s17 = scalar_lea.vmem (!%p1154_p10), [#allocation2], %s573_s14 }
  0x51   : > { %866 = dma.done.wait (%p1155_p4), %s231_s16, 128  }
  0x52   : > { %868 = vsyncadd (%p1155_p4), %s231_s16, 4294967168  ;;  %p1156_p8 = scmp.eq.s32.totalorder %s952_s22, 0 }
  0x54   : > { %870 = dma.done.wait (%p1156_p8), [#allocation6], 3328   ;;  %p1157_p3 = pmov %p1156_p8 }
  0x55   : > { %v898_v0 = vmov 0.0   ;;  %vm899_vm0 = vmmov 0   ;;  %v279_v1 = vld [vmem:[#allocation5 + $0x48] sm:$0xff]  ;;  %v278_v2 = vld [vmem:[#allocation5 + $0x40] sm:$0xff]  ;;  %v277_v3 = vld [vmem:[#allocation5 + $0x38] sm:$0xff]  ;;  %vm287_vm1 = vcmask 654336  }
  0x56   : > { %872 = vsyncadd (%p1157_p3), [#allocation6], 4294963968  ;;  %612 = vmatprep.subr.mxu0 %v898_v0  ;;  %632 = vmatprep.mubr.msk.f32.mxu0 %vm899_vm0, %v898_v0  ;;  %v377_v4 = vld [vmem:[#allocation7 + $0x78] sm:$0xff]  ;;  %v276_v5 = vld [vmem:[#allocation5 + $0x30] sm:$0xff]  ;;  %s581_s11 = sshll.u32 %s952_s22, 7  ;;  %s268_s12 = scalar_lea.vmem [#allocation8], %s573_s14 }
  0x57   : > { %635 = vmatprep.subr.mxu1 %v898_v0  ;;  %667 = vmatprep.mubr.msk.f32.mxu1 %vm899_vm0, %v898_v0  ;;  %v376_v6 = vld [vmem:[#allocation7 + $0x70] sm:$0xff]  ;;  %v375_v7 = vld [vmem:[#allocation7 + $0x68] sm:$0xff]  ;;  %v275_v8 = vld [vmem:[#allocation5 + $0x28] sm:$0xff]  ;;  %s476_s30 = sshll.u32 %s268_s12, 4  ;;  %s474_s28 = scalar_lea.hbm %s1142_s5, %s581_s11  ;;  %s477_s30 = int_to_ptr.vmem [resolvable:$true] %s476_s30 }
  0x58   : > { %613 = vmatpush3.msra.mxu0 %v279_v1  ;;  %636 = vmatpush3.msra.mxu1 %v377_v4  ;;  %v374_v9 = vld [vmem:[#allocation7 + $0x60] sm:$0xff]  ;;  %v274_v10 = vld [vmem:[#allocation5 + $0x20] sm:$0xff]  ;;  %v373_v11 = vld [vmem:[#allocation7 + $0x58] sm:$0xff]  ;;  %s463_s7 = scalar_lea.sflag [#allocation4], %s1049_s13  ;;  %s823_s9 = scalar_lea.vmem %s477_s30, 128 }
  0x59   : > { %614 = vmatprep.subr.mxu0 %v898_v0  ;;  %637 = vmatprep.subr.mxu1 %v898_v0  ;;  %v273_v12 = vld [vmem:[#allocation5 + $0x18] sm:$0xff]  ;;  %v372_v13 = vld [vmem:[#allocation7 + $0x50] sm:$0xff]  ;;  %v272_v14 = vld [vmem:[#allocation5 + $0x10] sm:$0xff]  ;;  %p824_p11 = scmp.ne.s32.totalorder %s477_s30, %s823_s9  ;;  %p1158_p0 = scmp.ne.s32.totalorder %s1152_s23, 0 }
  0x5a   : > { %615 = vmatpush3.msra.mxu0 %v278_v2  ;;  %638 = vmatpush3.msra.mxu1 %v376_v6  ;;  %v371_v15 = vld [vmem:[#allocation7 + $0x48] sm:$0xff]  ;;  %v271_v16 = vld [vmem:[#allocation5 + $0x8] sm:$0xff]  ;;  %v370_v17 = vld [vmem:[#allocation7 + $0x40] sm:$0xff]  ;;  %s900_s16 = smov [#allocation8]  }
  0x5b   : > { %616 = vmatprep.subr.mxu0 %v898_v0  ;;  %639 = vmatprep.subr.mxu1 %v898_v0  ;;  %v270_v18 = vld [vmem:[#allocation5] sm:$0xff]  ;;  %v269_v19 = vld [vmem:[%s1055_s17] sm:$0xff]  ;;  %v369_v20 = vld [vmem:[#allocation7 + $0x38] sm:$0xff]  ;;  %p825_p1 = pnand %p824_p11, %p1158_p0  ;;  %s827_s17 = sshll.u32 %s900_s16, 4  ;;  %s828_s17 = int_to_ptr.vmem [resolvable:$false] %s827_s17 }
  0x5c   : > { %617 = vmatpush3.msra.mxu0 %v277_v3  ;;  %640 = vmatpush3.msra.mxu1 %v375_v7  ;;  %v368_v21 = vld [vmem:[#allocation7 + $0x30] sm:$0xff]  ;;  %v367_v22 = vld [vmem:[#allocation7 + $0x28] sm:$0xff]  ;;  %v366_v23 = vld [vmem:[#allocation7 + $0x20] sm:$0xff]  ;;  %s829_s22 = scalar_lea.vmem %s828_s17, 256  ;;  %p830_p6 = scmp.lt.s32.totalorder %s477_s30, %s828_s17 }
  0x5d   : > { %618 = vmatprep.subr.mxu0 %v898_v0  ;;  %641 = vmatprep.subr.mxu1 %v898_v0  ;;  %v365_v24 = vld [vmem:[#allocation7 + $0x18] sm:$0xff]  ;;  %v364_v25 = vld [vmem:[#allocation7 + $0x10] sm:$0xff]  ;;  %v363_v26 = vld [vmem:[#allocation7 + $0x8] sm:$0xff]  ;;  %p826_p2 = pneg %p825_p1  ;;  %p831_p12 = scmp.lt.s32.totalorder %s829_s22, %s823_s9 }
  0x5e   : > { %619 = vmatpush3.msra.mxu0 %v276_v5  ;;  %642 = vmatpush3.msra.mxu1 %v374_v9  ;;  %v362_v27 = vld [vmem:[#allocation7] sm:$0xff] }
  0x5f   : > { %620 = vmatprep.subr.mxu0 %v898_v0  ;;  %643 = vmatprep.subr.mxu1 %v898_v0  ;;  %v577_v28 = vld [vmem:[%s1139_s2] ss:$0 sm:$0xff]  ;;  %p832_p7 = por %p831_p12, %p830_p6 }
  0x60   : > { %621 = vmatpush3.msra.mxu0 %v275_v8  ;;  %644 = vmatpush3.msra.mxu1 %v373_v11  ;;  %v579_v33 = vld [vmem:[%s1141_s4] ss:$0 sm:$0xff] }
  0x61   : > { %622 = vmatprep.subr.mxu0 %v898_v0  ;;  %645 = vmatprep.subr.mxu1 %v898_v0  ;;  %p833_p9 = pnand %p832_p7, %p826_p2 }
  0x62   : > { %623 = vmatpush3.msra.mxu0 %v274_v10  ;;  %646 = vmatpush3.msra.mxu1 %v372_v13 }
  0x63   : > { %624 = vmatprep.subr.mxu0 %v898_v0  ;;  %647 = vmatprep.subr.mxu1 %v898_v0 }
  0x64   : > { %625 = vmatpush3.msra.mxu0 %v273_v12  ;;  %648 = vmatpush3.msra.mxu1 %v371_v15 }
  0x65   : > { %626 = vmatprep.subr.mxu0 %v898_v0  ;;  %649 = vmatprep.subr.mxu1 %v898_v0 }
  0x66   : > { %627 = vmatpush3.msra.mxu0 %v272_v14  ;;  %650 = vmatpush3.msra.mxu1 %v370_v17 }
  0x67   : > { %628 = vmatprep.subr.mxu0 %v898_v0  ;;  %651 = vmatprep.subr.mxu1 %v898_v0 }
  0x68   : > { %629 = vmatpush3.msra.mxu0 %v271_v16  ;;  %652 = vmatpush3.msra.mxu1 %v369_v20 }
  0x69   : > { %630 = vmatprep.subr.mxu0 %v898_v0  ;;  %653 = vmatprep.subr.mxu1 %v898_v0 }
  0x6a   : > { %631 = vmatpush3.msra.mxu0 %v270_v18  ;;  %654 = vmatpush3.msra.mxu1 %v368_v21 }
  0x6b   : > { %633 = vmatmul.mubr.msk.f32.vlgmr.msra.gmra.mxu0 %vm287_vm1, %v269_v19  ;;  %655 = vmatprep.subr.mxu1 %v898_v0 }
  0x6c   : > { %656 = vmatpush3.msra.mxu1 %v367_v22 }
  0x6d   : > { %657 = vmatprep.subr.mxu1 %v898_v0 }
  0x6e   : > { %658 = vmatpush3.msra.mxu1 %v366_v23 }
  0x6f   : > { %659 = vmatprep.subr.mxu1 %v898_v0 }
  0x70   : > { %660 = vmatpush3.msra.mxu1 %v365_v24 }
  0x71   : > { %661 = vmatprep.subr.mxu1 %v898_v0 }
  0x72   : > { %662 = vmatpush3.msra.mxu1 %v364_v25 }
  0x73   : > { %663 = vmatprep.subr.mxu1 %v898_v0 }
  0x74   : > { %664 = vmatpush3.msra.mxu1 %v363_v26 }
  0x75   : > { %665 = vmatprep.subr.mxu1 %v898_v0 }
  0x76   : > { %666 = vmatpush3.msra.mxu1 %v362_v27 }
 0x12b   : > { %v357_v29 = vpop.f32.mrf.mxu0 }
 0x12c   : > { %v358_v30 = vadd.f32 %v577_v28, %v357_v29 }
 0x12d   : > { %v634_v31 = vpop.f32.mrf.mxu0 }
 0x12e   : > { %v361_v32 = vmax.f32 %v358_v30, 0.0 }
 0x130   : > { %668 = vmatmul.mubr.f32.vlgmr.msra.gmra.mxu1 %v361_v32 }
 0x1f0   : > { %v451_v34 = vpop.f32.mrf.mxu1 }
 0x1f1   : > { %v452_v35 = vadd.f32 %v579_v33, %v451_v34 }
 0x1f2   : > { %v669_v36 = vpop.f32.mrf.mxu1 }
 0x1f3   : > { %v455_v37 = vmul.f32 %v452_v35, %v452_v35 }
 0x1f5   : > { %456 = vadd.xlane.f32.xlu0 %v455_v37 }
 0x27e   : > { %v457_v38 = vpop.xlane.xlu0 %456 }
 0x27f   : > { %v458_v39 = vmax.f32 %v457_v38, 1e-24 }
 0x281   : > { %741 = vrsqrt.f32 %v458_v39 }
 0x28e   : > { %v742_v40 = vpop.eup %741 }
 0x28f   : > { %v460_v41 = vmul.f32 %v742_v40, %v452_v35 }
 0x291   : > { %461 = vst [vmem:[%s268_s12] sm:$0xff] %v460_v41 }
 0x292   : > { %836 = shalt.err (!%p833_p9)
}
 0x293   : > { %s837_s14 = scalar_lea.hbm %s474_s28, 128  ;;  %s841_s26 = scalar_lea.hbm %s1142_s5, 256 }
 0x294   : > { %p838_p13 = scmp.ne.s32.totalorder %s474_s28, %s837_s14  ;;  %p842_p4 = scmp.lt.s32.totalorder %s474_s28, %s1142_s5 }
 0x295   : > { %p843_p8 = scmp.lt.s32.totalorder %s841_s26, %s837_s14 }
 0x296   : > { %p839_p5 = pnand %p838_p13, %p1158_p0 }
 0x297   : > { %p844_p3 = por %p843_p8, %p842_p4 }
 0x298   : > { %p840_p10 = pneg %p839_p5 }
 0x29a   : > { %p845_p11 = pnand %p844_p3, %p840_p10 }
 0x29c   : > { %848 = shalt.err (!%p845_p11)
}
 0x29d   : > { %680 = dma.vmem_to_hbm [thread:$0]  (%p1158_p0), %s477_s30, 128, %s474_s28, %s463_s7  }
 0x29e PF: > { %s488_s11 = sand.u32 1, %s879_s18   ;;  %p1159_p1 = scmp.ne.s32.totalorder %s1148_s25, 0 }
 0x29f   : > { %p1160_p2 = scmp.ge.s32.totalorder %s891_s21, 2  ;;  %s489_s12 = scalar_lea.sflag [#allocation4], %s488_s11 }
 0x2a1   : > { %p694_p6 = pnand %p1160_p2, %p1159_p1 }
 0x2a3   : > { %p695_p12 = pneg %p694_p6 }
 0x2a5   : > { %874 = dma.done.wait (%p695_p12), %s489_s12, 128  }
 0x2a6   : > { %876 = vsyncadd (%p695_p12), %s489_s12, 4294967168  ;;  %p19_p7 = scmp.ge.s32.totalorder %s1003_s15, 4   ;;  %s1161_s18 = smov %s883_s19 }
 0x2a7   : > { %s1162_s19 = smov %s887_s20  ;;  %s1163_s20 = smov %s1019_s27 }
 0x2a8   : > { %s1164_s21 = smov %s1003_s15  ;;  %21 = sbr.rel (!%p19_p7) target bundleno = 6 (0x6), region = 93 }
 0x2ad   :  { %494 = vsyncpa [#allocation3], 1 }
 0x2ae   :  { %496 = vsyncpa [#allocation3 + $0x1], 1 }
 0x2af   :  { %497 = vsyncpa [#allocation6], 1 }
 0x2b0   :  { %498 = vsyncpa [#allocation4], 1 }
 0x2b1   :  { %500 = vsyncpa [#allocation4 + $0x1], 1 }

</bundles_post_ra>
